<compile_context>
chip_gen: v6e
topology: v6e:2x2x1
jax: 0.10.0
libtpu: 0.0.40
codegen_flags: <defaults>
</compile_context>

<pallas_src>
import functools

import jax
import jax.numpy as jnp
from jax.experimental import pallas as pl
from jax.experimental.pallas import tpu as pltpu


def _round_up(n, m):
    return ((n + m - 1) // m) * m


# ---------------------------------------------------------------------------
# Fast path: wrapper-side im2col for conv1, k2 == 1.  One matmul per conv,
# no scratch, T-tiled (B, T/tq) parallel grid.
# ---------------------------------------------------------------------------
def _ffn_kernel_small(xcol_ref, w1_ref, b1_ref, w2_ref, p3_ref, o_ref,
                      *, eps, d_in):
    # xcol_ref : (1, tq, d_in_p)   im2col of x, center tap in lanes [0, d_in)
    # w1_ref   : (d_in_p, d_hid_p) conv1 weight, im2col-flat (tap-reordered)
    # b1_ref   : (1, d_hid_p)      f32
    # w2_ref   : (d_hid_p, d_in_p) conv2 (k2=1) weight
    # p3_ref   : (3, d_in_p)       f32 packed [b2; gamma; beta]
    d_in_p = o_ref.shape[2]
    cdt = xcol_ref.dtype

    xc = xcol_ref[0]                                        # (tq, d_in_p)

    # conv1: single fused im2col MXU contraction (K = d_in_p = 128)
    acc1 = jnp.dot(xc, w1_ref[...], preferred_element_type=jnp.float32)
    h = jnp.maximum(acc1 + b1_ref[...], 0.0).astype(cdt)    # (tq, d_hid_p)

    # conv2 (k2 == 1): plain matmul
    y = jnp.dot(h, w2_ref[...], preferred_element_type=jnp.float32)

    b2 = p3_ref[0:1, :]
    gamma = p3_ref[1:2, :]
    beta = p3_ref[2:3, :]

    # residual = center tap = lanes [0, d_in) of the im2col block; padded
    # lanes must be exact zero so the unmasked LN mean stays correct.
    if d_in != d_in_p:
        lane = jax.lax.broadcasted_iota(jnp.int32, (1, d_in_p), 1)
        resid = jnp.where(lane < d_in, xc.astype(jnp.float32), 0.0)
    else:
        lane = None
        resid = xc.astype(jnp.float32)

    # dropout (identity, eval) + residual + LayerNorm over the real d_in lanes
    y = y + b2 + resid                                       # padded lanes stay 0
    inv_n = 1.0 / d_in
    mean = jnp.sum(y, axis=-1, keepdims=True) * inv_n
    centered = y - mean
    centered_m = centered if lane is None else jnp.where(lane < d_in, centered, 0.0)
    var = jnp.sum(centered_m * centered_m, axis=-1, keepdims=True) * inv_n
    y_norm = centered * jax.lax.rsqrt(var + eps)
    # gamma/beta are zero in the padded lanes -> padded output lanes are 0.
    o_ref[0] = (y_norm * gamma + beta).astype(o_ref.dtype)


# ---------------------------------------------------------------------------
# General path: in-kernel halo scratch (sublane-aligned) + per-tap matmul
# accumulation (no materialized im2col buffer).
# ---------------------------------------------------------------------------
def _ffn_kernel_general(x_ref, w1_ref, b1_ref, w2_ref, p3_ref, o_ref, *scratch,
                        eps, d_in, k1, k2):
    # x_ref  : (1, T, d_in_p)            input block (also the residual)
    # w1_ref : (k1*d_in_p, d_hid_p)      conv1 weight, tap-major
    # w2_ref : (k2*d_hid_p, d_in_p)      conv2 weight, tap-major
    # b1_ref : (1, d_hid_p) f32; p3_ref: (3, d_in_p) f32 [b2; gamma; beta]
    T, d_in_p = x_ref.shape[1], x_ref.shape[2]
    d_hid_p = b1_ref.shape[1]
    pad1 = (k1 - 1) // 2
    pad2 = (k2 - 1) // 2
    cdt = x_ref.dtype

    si = 0
    xpad_ref = hpad_ref = None
    if pad1 > 0:
        xpad_ref = scratch[si]
        si += 1
    if pad2 > 0:
        hpad_ref = scratch[si]
        si += 1

    x = x_ref[0]  # (T, d_in_p); doubles as the residual

    # ---- conv1: per-tap matmul accumulation (K = d_in_p per tap) ----
    if pad1 > 0:
        f1 = _round_up(pad1, 8)  # sublane-aligned offset for the bulk copy
        xpad_ref[f1 - pad1:f1, :] = jnp.zeros((pad1, d_in_p), cdt)
        xpad_ref[f1 + T:f1 + T + pad1, :] = jnp.zeros((pad1, d_in_p), cdt)
        xpad_ref[f1:f1 + T, :] = x
        start = f1 - pad1
        acc1 = jnp.dot(xpad_ref[start:start + T, :], w1_ref[0:d_in_p, :],
                       preferred_element_type=jnp.float32)
        for j in range(1, k1):
            acc1 = acc1 + jnp.dot(
                xpad_ref[start + j:start + j + T, :],
                w1_ref[j * d_in_p:(j + 1) * d_in_p, :],
                preferred_element_type=jnp.float32)
    else:
        acc1 = jnp.dot(x, w1_ref[...], preferred_element_type=jnp.float32)
    h = jnp.maximum(acc1 + b1_ref[...], 0.0).astype(cdt)     # (T, d_hid_p)

    # ---- conv2 (k2 == 1: plain matmul, no scratch) ----
    if pad2 > 0:
        f2 = _round_up(pad2, 8)
        hpad_ref[f2 - pad2:f2, :] = jnp.zeros((pad2, d_hid_p), cdt)
        hpad_ref[f2 + T:f2 + T + pad2, :] = jnp.zeros((pad2, d_hid_p), cdt)
        hpad_ref[f2:f2 + T, :] = h
        s2 = f2 - pad2
        y = jnp.dot(hpad_ref[s2:s2 + T, :], w2_ref[0:d_hid_p, :],
                    preferred_element_type=jnp.float32)
        for j in range(1, k2):
            y = y + jnp.dot(
                hpad_ref[s2 + j:s2 + j + T, :],
                w2_ref[j * d_hid_p:(j + 1) * d_hid_p, :],
                preferred_element_type=jnp.float32)
    else:
        y = jnp.dot(h, w2_ref[...], preferred_element_type=jnp.float32)

    b2 = p3_ref[0:1, :]
    gamma = p3_ref[1:2, :]
    beta = p3_ref[2:3, :]

    # ---- dropout (identity, eval) + residual + LayerNorm over real d_in ----
    y = y + b2 + x.astype(jnp.float32)                        # padded lanes stay 0
    inv_n = 1.0 / d_in
    mean = jnp.sum(y, axis=-1, keepdims=True) * inv_n
    centered = y - mean
    if d_in != d_in_p:
        lane = jax.lax.broadcasted_iota(jnp.int32, (1, d_in_p), 1)
        centered_m = jnp.where(lane < d_in, centered, 0.0)
    else:
        centered_m = centered
    var = jnp.sum(centered_m * centered_m, axis=-1, keepdims=True) * inv_n
    y_norm = centered * jax.lax.rsqrt(var + eps)
    o_ref[0] = (y_norm * gamma + beta).astype(o_ref.dtype)


def positionwise_feed_forward(x, w1, b1, w2, b2, gamma, beta, eps=1e-5,
                              time_tile=512):
    """x: (B, T, d_in); w1: (d_hid, d_in, k1); w2: (d_in, d_hid, k2) (PyTorch conv layout)."""
    B, T, d_in = x.shape
    d_hid, _, k1 = w1.shape
    _, _, k2 = w2.shape
    if k1 % 2 == 0 or k2 % 2 == 0:
        raise NotImplementedError(
            "only odd kernel sizes ('same' padding, length-preserving) are supported")
    pad1 = (k1 - 1) // 2
    pad2 = (k2 - 1) // 2

    # Lane-dense channel padding (no-op when already a multiple of 128).
    d_in_p = _round_up(d_in, 128)
    d_hid_p = _round_up(d_hid, 128)
    cdt = x.dtype  # MXU operand dtype follows the activations (bf16 or f32)

    # Packed small params: one (3, d_in_p) stream for b2/gamma/beta (+ b1 alone).
    p3 = jnp.stack([
        jnp.pad(b2, (0, d_in_p - d_in)),
        jnp.pad(gamma, (0, d_in_p - d_in)),
        jnp.pad(beta, (0, d_in_p - d_in)),
    ], axis=0).astype(jnp.float32)
    b1_r = jnp.pad(b1, (0, d_hid_p - d_hid)).reshape(1, d_hid_p).astype(jnp.float32)

    itemsize = jnp.dtype(cdt).itemsize
    use_small = (_round_up(k1 * d_in, 128) <= d_in_p) and (k2 == 1)

    if use_small:
        # ---------------- fast path: wrapper-side im2col ----------------
        K1P = d_in_p                      # == round_up(k1*d_in, 128) by the guard
        tq = T if T <= time_tile else time_tile
        Tp = _round_up(T, tq)

        # Zero-pad time to a tile multiple, add the conv halo, then im2col with
        # the CENTER tap first so the residual lives in lanes [0, d_in).
        x_tp = jnp.pad(x, ((0, 0), (0, Tp - T), (0, 0)))
        x_halo = jnp.pad(x_tp, ((0, 0), (pad1, pad1), (0, 0)))
        order = [pad1] + [j for j in range(k1) if j != pad1]
        x_col = jnp.concatenate([x_halo[:, j:j + Tp, :] for j in order], axis=-1)
        x_col = jnp.pad(x_col, ((0, 0), (0, 0), (0, K1P - k1 * d_in))).astype(cdt)

        # Conv weights -> same tap order, im2col-flat, channel-padded.
        w1_k = jnp.transpose(w1, (2, 1, 0))[jnp.array(order)]   # (k1, d_in, d_hid)
        w1_flat = jnp.pad(w1_k.reshape(k1 * d_in, d_hid),
                          ((0, K1P - k1 * d_in), (0, d_hid_p - d_hid))).astype(cdt)
        w2_flat = jnp.pad(jnp.transpose(w2[:, :, 0], (1, 0)),
                          ((0, d_hid_p - d_hid), (0, d_in_p - d_in))).astype(cdt)

        kernel = functools.partial(_ffn_kernel_small, eps=eps, d_in=d_in)
        grid = (B, Tp // tq)
        grid_spec = pltpu.PrefetchScalarGridSpec(
            num_scalar_prefetch=0,
            grid=grid,
            in_specs=[
                pl.BlockSpec((1, tq, K1P), lambda b, t: (b, t, 0)),      # x_col (+residual)
                pl.BlockSpec((K1P, d_hid_p), lambda b, t: (0, 0)),       # w1
                pl.BlockSpec((1, d_hid_p), lambda b, t: (0, 0)),         # b1
                pl.BlockSpec((d_hid_p, d_in_p), lambda b, t: (0, 0)),    # w2
                pl.BlockSpec((3, d_in_p), lambda b, t: (0, 0)),          # b2/gamma/beta
            ],
            out_specs=pl.BlockSpec((1, tq, d_in_p), lambda b, t: (b, t, 0)),
        )

        flops = 2 * B * Tp * (K1P * d_hid_p + d_hid_p * d_in_p)
        bytes_accessed = ((B * Tp * K1P + B * Tp * d_in_p) * itemsize
                          + (K1P * d_hid_p + d_hid_p * d_in_p) * itemsize
                          + (p3.size + b1_r.size) * 4)
        cost = pl.CostEstimate(flops=flops, transcendentals=B * Tp,
                               bytes_accessed=bytes_accessed)

        vmem_est = (2 * (tq * K1P + tq * d_in_p) * itemsize
                    + 2 * (K1P * d_hid_p + d_hid_p * d_in_p) * itemsize
                    + 6 * tq * max(d_hid_p, d_in_p) * 4)
        cp = dict(dimension_semantics=("parallel", "parallel"))
        if vmem_est > 32 * 1024 * 1024:
            cp["vmem_limit_bytes"] = min(int(vmem_est * 3 // 2), 100 * 1024 * 1024)

        out_p = pl.pallas_call(
            kernel,
            out_shape=jax.ShapeDtypeStruct((B, Tp, d_in_p), x.dtype),
            grid_spec=grid_spec,
            compiler_params=pltpu.CompilerParams(**cp),
            cost_estimate=cost,
        )(x_col, w1_flat, b1_r, w2_flat, p3)
        return out_p[:, :T, :d_in]

    # ------------------- general path: in-kernel halo -------------------
    x_p = jnp.pad(x, ((0, 0), (0, 0), (0, d_in_p - d_in))).astype(cdt)

    # Conv weights -> tap-major, channel-padded, flattened:
    #   w1_flat[j*d_in_p + c, o] = torch_w1[o, c, j]
    w1_k = jnp.pad(jnp.transpose(w1, (2, 1, 0)),
                   ((0, 0), (0, d_in_p - d_in), (0, d_hid_p - d_hid)))
    w1_flat = w1_k.reshape(k1 * d_in_p, d_hid_p).astype(cdt)
    w2_k = jnp.pad(jnp.transpose(w2, (2, 1, 0)),
                   ((0, 0), (0, d_hid_p - d_hid), (0, d_in_p - d_in)))
    w2_flat = w2_k.reshape(k2 * d_hid_p, d_in_p).astype(cdt)

    scratch_shapes = []
    if pad1 > 0:
        scratch_shapes.append(
            pltpu.VMEM((_round_up(pad1, 8) + T + pad1, d_in_p), cdt))
    if pad2 > 0:
        scratch_shapes.append(
            pltpu.VMEM((_round_up(pad2, 8) + T + pad2, d_hid_p), cdt))

    kernel = functools.partial(_ffn_kernel_general, eps=eps, d_in=d_in,
                               k1=k1, k2=k2)
    grid_spec = pltpu.PrefetchScalarGridSpec(
        num_scalar_prefetch=0,
        grid=(B,),
        in_specs=[
            pl.BlockSpec((1, T, d_in_p), lambda b: (b, 0, 0)),          # x (+residual)
            pl.BlockSpec((k1 * d_in_p, d_hid_p), lambda b: (0, 0)),     # w1
            pl.BlockSpec((1, d_hid_p), lambda b: (0, 0)),               # b1
            pl.BlockSpec((k2 * d_hid_p, d_in_p), lambda b: (0, 0)),     # w2
            pl.BlockSpec((3, d_in_p), lambda b: (0, 0)),                # b2/gamma/beta
        ],
        out_specs=pl.BlockSpec((1, T, d_in_p), lambda b: (b, 0, 0)),
        scratch_shapes=scratch_shapes,
    )

    flops = 2 * B * T * (k1 * d_in_p * d_hid_p + k2 * d_hid_p * d_in_p)
    bytes_accessed = (2 * B * T * d_in_p * itemsize
                      + (w1_flat.size + w2_flat.size) * itemsize
                      + (p3.size + b1_r.size) * 4)
    cost = pl.CostEstimate(flops=flops, transcendentals=B * T,
                           bytes_accessed=bytes_accessed)

    vmem_est = (4 * T * d_in_p * itemsize
                + 2 * (w1_flat.size + w2_flat.size) * itemsize
                + sum((_round_up(p, 8) + T + p) * d * itemsize
                      for p, d in ((pad1, d_in_p), (pad2, d_hid_p)) if p > 0)
                + 6 * T * max(d_hid_p, d_in_p) * 4)
    cp = dict(dimension_semantics=("parallel",))
    if vmem_est > 32 * 1024 * 1024:
        cp["vmem_limit_bytes"] = min(int(vmem_est * 3 // 2), 100 * 1024 * 1024)

    out_p = pl.pallas_call(
        kernel,
        out_shape=jax.ShapeDtypeStruct((B, T, d_in_p), x.dtype),
        grid_spec=grid_spec,
        compiler_params=pltpu.CompilerParams(**cp),
        cost_estimate=cost,
    )(x_p, w1_flat, b1_r, w2_flat, p3)
    return out_p[:, :, :d_in]


def _reference(x, w1, b1, w2, b2, gamma, beta, eps=1e-5):
    """Pure-JAX reference mirroring the PyTorch forward (eval mode)."""
    _, _, k1 = w1.shape
    _, _, k2 = w2.shape
    xc = jnp.transpose(x, (0, 2, 1))  # (B, d_in, T)  NCL
    h = jax.lax.conv_general_dilated(
        xc, w1, window_strides=(1,), padding=[((k1 - 1) // 2,) * 2],
        dimension_numbers=("NCH", "OIH", "NCH")) + b1[None, :, None]
    h = jnp.maximum(h, 0.0)
    y = jax.lax.conv_general_dilated(
        h, w2, window_strides=(1,), padding=[((k2 - 1) // 2,) * 2],
        dimension_numbers=("NCH", "OIH", "NCH")) + b2[None, :, None]
    y = jnp.transpose(y, (0, 2, 1)) + x
    mean = jnp.mean(y, axis=-1, keepdims=True)
    var = jnp.mean(jnp.square(y - mean), axis=-1, keepdims=True)
    return (y - mean) * jax.lax.rsqrt(var + eps) * gamma + beta


if __name__ == "__main__":
    # Small config consistent with the module: d_in=8, d_hid=32
    B, T, d_in, d_hid = 2, 16, 8, 32

    def make_inputs(key, k1, k2):
        kx, kw1, kb1, kw2, kb2, kg, kbt = jax.random.split(key, 7)
        x = jax.random.normal(kx, (B, T, d_in), dtype=jnp.float32)
        w1 = jax.random.normal(kw1, (d_hid, d_in, k1), dtype=jnp.float32) * 0.1
        b1 = jax.random.normal(kb1, (d_hid,), dtype=jnp.float32) * 0.1
        w2 = jax.random.normal(kw2, (d_in, d_hid, k2), dtype=jnp.float32) * 0.1
        b2 = jax.random.normal(kb2, (d_in,), dtype=jnp.float32) * 0.1
        gamma = 1.0 + 0.1 * jax.random.normal(kg, (d_in,), dtype=jnp.float32)
        beta = 0.1 * jax.random.normal(kbt, (d_in,), dtype=jnp.float32)
        return x, w1, b1, w2, b2, gamma, beta

    key = jax.random.PRNGKey(0)
    k_a, k_b = jax.random.split(key)

    # Shipped config kernel_size=(9, 1): wrapper-im2col fast path.
    args_a = make_inputs(k_a, 9, 1)
    out_a = jax.block_until_ready(positionwise_feed_forward(*args_a))
    ref_a = _reference(*args_a)
    assert out_a.shape == (B, T, d_in)
    assert jnp.allclose(out_a, ref_a, atol=1e-4, rtol=1e-4), "fast-path mismatch"

    # General odd kernel sizes (5, 3): in-kernel halo + per-tap matmul path.
    args_b = make_inputs(k_b, 5, 3)
    out_b = jax.block_until_ready(positionwise_feed_forward(*args_b))
    ref_b = _reference(*args_b)
    assert out_b.shape == (B, T, d_in)
    assert jnp.allclose(out_b, ref_b, atol=1e-4, rtol=1e-4), "general-path mismatch"

    print("KERNEL_OK")
</pallas_src>

<mosaic_0001>
module attributes {stable_mosaic.version = 11 : i64} {
  func.func @_ffn_kernel_small(%arg0: i32, %arg1: i32, %arg2: memref<1x16x128xf32, #tpu.memory_space<vmem>>, %arg3: memref<128x128xf32, #tpu.memory_space<vmem>>, %arg4: memref<1x128xf32, #tpu.memory_space<vmem>>, %arg5: memref<128x128xf32, #tpu.memory_space<vmem>>, %arg6: memref<3x128xf32, #tpu.memory_space<vmem>>, %arg7: memref<1x16x128xf32, #tpu.memory_space<vmem>>) attributes {dimension_semantics = [#tpu.dimension_semantics<parallel>, #tpu.dimension_semantics<parallel>], iteration_bounds = array<i64: 2, 1>, scalar_prefetch = 0 : i64, scratch_operands = 0 : i64, tpu.core_type = #tpu.core_type<tc>, window_params = [{transform_indices = @transform_0, window_bounds = array<i64: 1, 16, 128>}, {pipeline_mode = #tpu.pipeline_mode<synchronous>, transform_indices = @transform_1, window_bounds = array<i64: 128, 128>}, {pipeline_mode = #tpu.pipeline_mode<synchronous>, transform_indices = @transform_2, window_bounds = array<i64: 1, 128>}, {pipeline_mode = #tpu.pipeline_mode<synchronous>, transform_indices = @transform_3, window_bounds = array<i64: 128, 128>}, {pipeline_mode = #tpu.pipeline_mode<synchronous>, transform_indices = @transform_4, window_bounds = array<i64: 3, 128>}, {transform_indices = @transform_5, window_bounds = array<i64: 1, 16, 128>}]} {
    %c0 = arith.constant 0 : index
    %c0_0 = arith.constant 0 : index
    %c0_1 = arith.constant 0 : index
    %0 = vector.load %arg2[%c0, %c0_0, %c0_1] : memref<1x16x128xf32, #tpu.memory_space<vmem>>, vector<1x16x128xf32>
    %1 = vector.shape_cast %0 : vector<1x16x128xf32> to vector<16x128xf32>
    %c0_2 = arith.constant 0 : index
    %c0_3 = arith.constant 0 : index
    %2 = vector.load %arg3[%c0_2, %c0_3] : memref<128x128xf32, #tpu.memory_space<vmem>>, vector<128x128xf32>
    %cst = arith.constant dense<0.000000e+00> : vector<16x128xf32>
    %3 = tpu.matmul %1, %2, %cst {dimension_numbers = #tpu.dot_dimension_numbers<[1], [0], [0], [1], [0, 0, 1, 1], [], []>} : vector<16x128xf32>, vector<128x128xf32>, vector<16x128xf32> -> vector<16x128xf32>
    %c0_4 = arith.constant 0 : index
    %c0_5 = arith.constant 0 : index
    %4 = vector.load %arg4[%c0_4, %c0_5] : memref<1x128xf32, #tpu.memory_space<vmem>>, vector<1x128xf32>
    %5 = vector.broadcast %4 : vector<1x128xf32> to vector<16x128xf32>
    %6 = arith.addf %3, %5 : vector<16x128xf32>
    %cst_6 = arith.constant 0.000000e+00 : f32
    %7 = vector.broadcast %cst_6 : f32 to vector<16x128xf32>
    %8 = arith.maximumf %6, %7 : vector<16x128xf32>
    %c0_7 = arith.constant 0 : index
    %c0_8 = arith.constant 0 : index
    %9 = vector.load %arg5[%c0_7, %c0_8] : memref<128x128xf32, #tpu.memory_space<vmem>>, vector<128x128xf32>
    %cst_9 = arith.constant dense<0.000000e+00> : vector<16x128xf32>
    %10 = tpu.matmul %8, %9, %cst_9 {dimension_numbers = #tpu.dot_dimension_numbers<[1], [0], [0], [1], [0, 0, 1, 1], [], []>} : vector<16x128xf32>, vector<128x128xf32>, vector<16x128xf32> -> vector<16x128xf32>
    %c0_10 = arith.constant 0 : index
    %c0_11 = arith.constant 0 : index
    %11 = vector.load %arg6[%c0_10, %c0_11] : memref<3x128xf32, #tpu.memory_space<vmem>>, vector<1x128xf32>
    %c1 = arith.constant 1 : index
    %c0_12 = arith.constant 0 : index
    %12 = vector.load %arg6[%c1, %c0_12] : memref<3x128xf32, #tpu.memory_space<vmem>>, vector<1x128xf32>
    %c2 = arith.constant 2 : index
    %c0_13 = arith.constant 0 : index
    %13 = vector.load %arg6[%c2, %c0_13] : memref<3x128xf32, #tpu.memory_space<vmem>>, vector<1x128xf32>
    %14 = tpu.iota {dimensions = array<i32: 1>} : vector<1x128xi32>
    %c8_i32 = arith.constant 8 : i32
    %15 = vector.broadcast %c8_i32 : i32 to vector<1x128xi32>
    %16 = arith.cmpi slt, %14, %15 : vector<1x128xi32>
    %cst_14 = arith.constant 0.000000e+00 : f32
    %17 = vector.shape_cast %16 : vector<1x128xi1> to vector<1x128xi1>
    %18 = vector.broadcast %17 : vector<1x128xi1> to vector<16x128xi1>
    %19 = vector.broadcast %cst_14 : f32 to vector<16x128xf32>
    %20 = arith.select %18, %1, %19 : vector<16x128xi1>, vector<16x128xf32>
    %21 = vector.broadcast %11 : vector<1x128xf32> to vector<16x128xf32>
    %22 = arith.addf %10, %21 : vector<16x128xf32>
    %23 = arith.addf %22, %20 : vector<16x128xf32>
    %cst_15 = arith.constant dense<0.000000e+00> : vector<16xf32>
    %24 = vector.multi_reduction <add>, %23, %cst_15 [1] : vector<16x128xf32> to vector<16xf32>
    %25 = vector.shape_cast %24 : vector<16xf32> to vector<16x1xf32>
    %cst_16 = arith.constant 1.250000e-01 : f32
    %26 = vector.broadcast %cst_16 : f32 to vector<16x1xf32>
    %27 = arith.mulf %25, %26 : vector<16x1xf32>
    %28 = vector.broadcast %27 : vector<16x1xf32> to vector<16x128xf32>
    %29 = arith.subf %23, %28 : vector<16x128xf32>
    %c8_i32_17 = arith.constant 8 : i32
    %30 = vector.broadcast %c8_i32_17 : i32 to vector<1x128xi32>
    %31 = arith.cmpi slt, %14, %30 : vector<1x128xi32>
    %cst_18 = arith.constant 0.000000e+00 : f32
    %32 = vector.shape_cast %31 : vector<1x128xi1> to vector<1x128xi1>
    %33 = vector.broadcast %32 : vector<1x128xi1> to vector<16x128xi1>
    %34 = vector.broadcast %cst_18 : f32 to vector<16x128xf32>
    %35 = arith.select %33, %29, %34 : vector<16x128xi1>, vector<16x128xf32>
    %36 = arith.mulf %35, %35 : vector<16x128xf32>
    %cst_19 = arith.constant dense<0.000000e+00> : vector<16xf32>
    %37 = vector.multi_reduction <add>, %36, %cst_19 [1] : vector<16x128xf32> to vector<16xf32>
    %38 = vector.shape_cast %37 : vector<16xf32> to vector<16x1xf32>
    %cst_20 = arith.constant 1.250000e-01 : f32
    %39 = vector.broadcast %cst_20 : f32 to vector<16x1xf32>
    %40 = arith.mulf %38, %39 : vector<16x1xf32>
    %cst_21 = arith.constant 9.99999974E-6 : f32
    %41 = vector.broadcast %cst_21 : f32 to vector<16x1xf32>
    %42 = arith.addf %40, %41 : vector<16x1xf32>
    %43 = math.rsqrt %42 : vector<16x1xf32>
    %44 = vector.broadcast %43 : vector<16x1xf32> to vector<16x128xf32>
    %45 = arith.mulf %29, %44 : vector<16x128xf32>
    %46 = vector.broadcast %12 : vector<1x128xf32> to vector<16x128xf32>
    %47 = arith.mulf %45, %46 : vector<16x128xf32>
    %48 = vector.broadcast %13 : vector<1x128xf32> to vector<16x128xf32>
    %49 = arith.addf %47, %48 : vector<16x128xf32>
    %c0_22 = arith.constant 0 : index
    %c0_23 = arith.constant 0 : index
    %c0_24 = arith.constant 0 : index
    %50 = vector.load %arg7[%c0_22, %c0_23, %c0_24] : memref<1x16x128xf32, #tpu.memory_space<vmem>>, vector<1x16x128xf32>
    %51 = vector.shape_cast %50 : vector<1x16x128xf32> to vector<16x128xf32>
    %52 = vector.shape_cast %49 : vector<16x128xf32> to vector<1x16x128xf32>
    tpu.vector_store %arg7[%c0_22, %c0_23, %c0_24], %52 {strides = array<i32>} : memref<1x16x128xf32, #tpu.memory_space<vmem>>, vector<1x16x128xf32>,
    return
  }
  func.func @transform_0(%arg0: i32, %arg1: i32) -> (i32, i32, i32) {
    %c0_i32 = arith.constant 0 : i32
    %c0_i32_0 = arith.constant 0 : i32
    return %arg0, %arg1, %c0_i32 : i32, i32, i32
  }
  func.func @transform_1(%arg0: i32, %arg1: i32) -> (i32, i32) {
    %c0_i32 = arith.constant 0 : i32
    %c0_i32_0 = arith.constant 0 : i32
    %c0_i32_1 = arith.constant 0 : i32
    return %c0_i32, %c0_i32_0 : i32, i32
  }
  func.func @transform_2(%arg0: i32, %arg1: i32) -> (i32, i32) {
    %c0_i32 = arith.constant 0 : i32
    %c0_i32_0 = arith.constant 0 : i32
    %c0_i32_1 = arith.constant 0 : i32
    return %c0_i32, %c0_i32_0 : i32, i32
  }
  func.func @transform_3(%arg0: i32, %arg1: i32) -> (i32, i32) {
    %c0_i32 = arith.constant 0 : i32
    %c0_i32_0 = arith.constant 0 : i32
    %c0_i32_1 = arith.constant 0 : i32
    return %c0_i32, %c0_i32_0 : i32, i32
  }
  func.func @transform_4(%arg0: i32, %arg1: i32) -> (i32, i32) {
    %c0_i32 = arith.constant 0 : i32
    %c0_i32_0 = arith.constant 0 : i32
    %c0_i32_1 = arith.constant 0 : i32
    return %c0_i32, %c0_i32_0 : i32, i32
  }
  func.func @transform_5(%arg0: i32, %arg1: i32) -> (i32, i32, i32) {
    %c0_i32 = arith.constant 0 : i32
    %c0_i32_0 = arith.constant 0 : i32
    return %arg0, %arg1, %c0_i32 : i32, i32, i32
  }
}

</mosaic_0001>

<bundles_post_ra>
// kernel: tpu_custom_call.1
= control target key start
LH: loop header
LB: loop body
LE: loop exit
PB: predicated region body
PF: predicated region fallthrough
CT: control target
= control target key end

     0   :  { %s1312_s0 = inlined_call_operand.hbm [shape: f32[2,16,128], index: 0, kind: input, shape index: {}]   ;;  %s1313_s1 = inlined_call_operand.hbm [shape: f32[128,128], index: 1, kind: input, shape index: {}]   ;;  %s1314_s2 = inlined_call_operand.vmem [shape: f32[1,128], index: 2, kind: input, shape index: {}]   ;;  %s1315_s3 = inlined_call_operand.hbm [shape: f32[128,128], index: 3, kind: input, shape index: {}]   ;;  %s1316_s4 = inlined_call_operand.vmem [shape: f32[3,128], index: 4, kind: input, shape index: {}]   ;;  %s1317_s5 = inlined_call_operand.hbm [shape: f32[2,16,128], index: 5, kind: output, shape index: {}]  }
   0x1   :  { %1320 = sst [smem:[#allocation12_spill]] %s1313_s1 }
   0x2   :  { %10 = vsyncpa [#allocation3], 0 }
   0x3   :  { %12 = vsyncpa [#allocation3 + $0x1], 0 }
   0x4   :  { %13 = vsyncpa [#allocation6], 0 }
   0x5   :  { %14 = vsyncpa [#allocation4], 0 }
   0x6   :  { %16 = vsyncpa [#allocation4 + $0x1], 0  ;;  %s1087_s18 = smov 0   ;;  %s1089_s19 = smov 0  }
   0x7   :  { %s1091_s20 = smov 0   ;;  %s1093_s21 = smov 0  }
   0x8   :  { %s1095_s22 = smov 0   ;;  %s1097_s23 = smov 0  }
   0x9 LB: > { %s661_s24 = sadd.s32 4294967295, %s1047_s23   ;;  %s662_s25 = sadd.s32 4294967294, %s1047_s23   ;;  %s1047_s23 = sphi %s1097_s23, %s22_s23   ;;  %s1043_s22 = sphi %s1095_s22, %s1338_s22   ;;  %s1039_s21 = sphi %s1093_s21, %s1337_s21   ;;  %s1035_s20 = sphi %s1091_s20, %s1336_s20   ;;  %s1031_s19 = sphi %s1089_s19, %s1335_s19   ;;  %s1027_s18 = sphi %s1087_s18, %s1334_s18  }
   0xa   : > { %p56_p0 = scmp.ne.s32.totalorder %s1031_s19, %s1027_s18  ;;  %p1121_p1 = scmp.eq.s32.totalorder %s661_s24, 0 }
   0xb   : > { %p1125_p2 = scmp.eq.s32.totalorder %s661_s24, 1  ;;  %p172_p3 = scmp.eq.s32.totalorder %s662_s25, 1 }
   0xc   : > { %p1131_p4 = por %p1121_p1, %p56_p0  ;;  %p663_p5 = scmp.ge.s32.totalorder %s1047_s23, 1 }
   0xd   : > { %p1136_p6 = por %p172_p3, %p56_p0  ;;  %p179_p7 = scmp.lt.s32.totalorder %s1047_s23, 3 }
   0xe   : > { %s1049_s6 = smov [#allocation5]   ;;  %s1050_s9 = smov [#allocation7]  }
   0xf   : > { %s1324_s29 = scalar_select %p1136_p6, 1, 0 }
  0x10   : > { %p1141_p8 = pnand %p663_p5, %p179_p7  ;;  %s191_s7 = sshll.u32 %s1049_s6, 4  ;;  %s192_s7 = int_to_ptr.vmem [resolvable:$true] %s191_s7 }
  0x11   : > { %s207_s10 = sshll.u32 %s1050_s9, 4  ;;  %s894_s11 = scalar_lea.vmem %s192_s7, 2048  ;;  %s208_s10 = int_to_ptr.vmem [resolvable:$true] %s207_s10 }
  0x12   : > { %p804_p9 = pneg %p1141_p8  ;;  %p895_p13 = scmp.ne.s32.totalorder %s192_s7, %s894_s11 }
  0x13   : > { %p902_p5 = scmp.lt.s32.totalorder %s192_s7, %s192_s7  ;;  %p903_p7 = scmp.lt.s32.totalorder %s894_s11, %s894_s11 }
  0x14   : > { %p1150_p11 = pnand %p804_p9, %p1121_p1 }
  0x15   : > { %p904_p10 = por %p903_p7, %p902_p5 }
  0x16   : > { %p885_p12 = pneg %p1150_p11 }
  0x18   : > { %p897_p0 = pnand %p895_p13, %p885_p12 }
  0x1a   : > { %p898_p3 = pneg %p897_p0 }
  0x1c   : > { %p905_p9 = pnand %p904_p10, %p898_p3 }
  0x1e   : > { %908 = shalt.err (!%p905_p9)
}
  0x1f   : > { %s1318_s12 = smov 128   ;;  %s1319_s13 = smov 8  }
  0x20   : > { %s1327_s1 = sld [smem:[#allocation12_spill]]  ;;  %s920_s16 = scalar_lea.vmem %s208_s10, 2048 }
  0x21   : > { %p921_p13 = scmp.ne.s32.totalorder %s208_s10, %s920_s16  ;;  %p928_p10 = scmp.lt.s32.totalorder %s208_s10, %s208_s10 }
  0x22   : > { %p929_p3 = scmp.lt.s32.totalorder %s920_s16, %s920_s16 }
  0x23   : > { %p923_p0 = pnand %p921_p13, %p885_p12 }
  0x24   : > { %p930_p7 = por %p929_p3, %p928_p10 }
  0x25   : > { %p924_p5 = pneg %p923_p0 }
  0x26   : > { %807 = dma.hbm_to_vmem [thread:$0]  (!%p1150_p11), %s1327_s1, 2048, %s192_s7, [#allocation6], %s1318_s12, %s1318_s12, %s1319_s13  }
  0x27   : > { %p931_p9 = pnand %p930_p7, %p924_p5 }
  0x29   : > { %934 = shalt.err (!%p931_p9)
}
  0x2a   : > { %810 = dma.hbm_to_vmem [thread:$0]  (!%p1150_p11), %s1315_s3, 2048, %s208_s10, [#allocation6], %s1318_s12, %s1318_s12, %s1319_s13  }
  0x2b   : > { %s34_s25 = sadd.s32 1, %s1043_s22  ;;  %s43_s6 = sadd.s32 1, %s1035_s20 }
  0x2c   : > { %p36_p12 = scmp.ge.s32.totalorder %s34_s25, 2  ;;  %p50_p13 = scmp.ne.s32.totalorder %s1035_s20, %s1031_s19 }
  0x2d   : > { %p51_p0 = scmp.eq.s32.totalorder %s1047_s23, 0  ;;  %p821_p5 = scmp.lt.s32.totalorder %s1047_s23, 2 }
  0x2e   : > { %s1340_s25 = smov (%p36_p12, %s34_s25), 0  ;;  %p1188_p3 = por %p1125_p2, %p50_p13 }
  0x2f   : > { %p52_p10 = por %p51_p0, %p50_p13  ;;  %s38_s8 = ssub.s32 %s1043_s22, %s1340_s25 }
  0x30   : > { %s224_s9 = sand.u32 1, %s1035_s20   ;;  %p41_p7 = scmp.eq.s32.totalorder %s38_s8, 0 }
  0x31   : > { %s667_s10 = sshll.u32 %s224_s9, 4  ;;  %s684_s11 = sshll.u32 %s1043_s22, 8 }
  0x32   : > { %s1197_s14 = scalar_select %p41_p7, %s1035_s20, %s43_s6  }
  0x33   : > { %s236_s17 = scalar_lea.hbm %s1312_s0, %s684_s11  ;;  %s228_s24 = scalar_lea.vmem [#allocation2], %s667_s10 }
  0x34   : > { %s237_s12 = sshll.u32 %s228_s24, 4  ;;  %p1204_p11 = pnand %p821_p5, %p52_p10  ;;  %s238_s12 = int_to_ptr.vmem [resolvable:$true] %s237_s12 }
  0x35   : > { %s225_s13 = scalar_lea.sflag [#allocation3], %s224_s9  ;;  %s948_s8 = scalar_lea.vmem %s238_s12, 256 }
  0x36   : > { %p937_p2 = pneg %p1204_p11  ;;  %p949_p9 = scmp.ne.s32.totalorder %s238_s12, %s948_s8 }
  0x37   : > { %s1053_s6 = smov [#allocation2]  }
  0x38   : > { %p951_p12 = pnand %p949_p9, %p937_p2  ;;  %s953_s1 = sshll.u32 %s1053_s6, 4  ;;  %s954_s1 = int_to_ptr.vmem [resolvable:$false] %s953_s1 }
  0x39   : > { %s955_s11 = scalar_lea.vmem %s954_s1, 512  ;;  %p956_p0 = scmp.lt.s32.totalorder %s238_s12, %s954_s1 }
  0x3a   : > { %p952_p13 = pneg %p951_p12  ;;  %p957_p7 = scmp.lt.s32.totalorder %s955_s11, %s948_s8 }
  0x3c   : > { %p958_p6 = por %p957_p7, %p956_p0 }
  0x3e   : > { %p959_p5 = pnand %p958_p6, %p952_p13 }
  0x40   : > { %962 = shalt.err (!%p959_p5)
}
  0x41   : > { %s1330_s10 = smov 8   ;;  %s1331_s15 = smov 128  }
  0x42   : > { %814 = dma.hbm_to_vmem [thread:$0]  (!%p1204_p11), %s236_s17, 256, %s238_s12, %s225_s13, %s1331_s15, %s1331_s15, %s1330_s10  }
  0x43   : > { %249 = sbr.rel (%p1141_p8) target bundleno = 832 (0x340), region = 40  ;;  %s1218_s9 = sand.u32 (!%p1141_p8), 1, %s1031_s19  }
  0x44   : > { %s671_s1 = sshll.u32 (!%p1141_p8), %s1218_s9, 4  ;;  %s252_s16 = scalar_lea.sflag (!%p1141_p8), [#allocation3], %s1218_s9 }
  0x45   : > { %s1224_s24 = scalar_lea.vmem (!%p1141_p8), [#allocation2], %s671_s1 }
  0x48   : > { %1014 = dma.done.wait (%p1131_p4), %s252_s16, 256  }
  0x49   : > { %1016 = vsyncadd (%p1131_p4), %s252_s16, 4294967040 }
  0x4a   : > { %1018 = dma.done.wait (%p1121_p1), [#allocation6], 4096  }
  0x4b   : > { %1020 = vsyncadd (%p1121_p1), [#allocation6], 4294963200  ;;  %v309_v0 = vld [vmem:[#allocation5 + $0x78] sm:$0xff]  ;;  %v308_v1 = vld [vmem:[#allocation5 + $0x70] sm:$0xff]  ;;  %v413_v41 = vlaneseq  ;;  %s685_s6 = sshll.u32 %s1039_s21, 8  ;;  %s289_s11 = scalar_lea.vmem [#allocation8], %s671_s1 }
  0x4c   : > { %722 = vmatprep.subr.mxu0 %v309_v0  ;;  %v307_v2 = vld [vmem:[#allocation5 + $0x68] sm:$0xff]  ;;  %v306_v3 = vld [vmem:[#allocation5 + $0x60] sm:$0xff]  ;;  %v305_v5 = vld [vmem:[#allocation5 + $0x58] sm:$0xff]  ;;  %s555_s10 = sshll.u32 %s289_s11, 4  ;;  %s540_s26 = scalar_lea.sflag [#allocation4], %s1218_s9  ;;  %s1264_s10 = int_to_ptr.vmem [resolvable:$true] %s555_s10 }
  0x4d   : > { %723 = vmatpush3.msra.mxu0 %v309_v0  ;;  %v1235_v4 = vld [vmem:[%s1224_s24] sm:$0xff]  ;;  %v409_v6 = vld [vmem:[#allocation7 + $0x78] sm:$0xff]  ;;  %v407_v9 = vld [vmem:[#allocation7 + $0x68] sm:$0xff]  ;;  %v414_v42 = vand.u32 127, %v413_v41  ;;  %s963_s28 = scalar_lea.vmem %s1264_s10, 256  ;;  %s1054_s21 = smov [#allocation8]  }
  0x4e   : > { %724 = vmatprep.subr.mxu0 %v308_v1  ;;  %754 = vmatprep.mubr.f32.mxu0 %v1235_v4  ;;  %v408_v7 = vld [vmem:[#allocation7 + $0x70] sm:$0xff]  ;;  %v303_v10 = vld [vmem:[#allocation5 + $0x48] sm:$0xff]  ;;  %v406_v11 = vld [vmem:[#allocation7 + $0x60] sm:$0xff]  ;;  %p964_p1 = scmp.ne.s32.totalorder %s1264_s10, %s963_s28  ;;  %s967_s1 = sshll.u32 %s1054_s21, 4  ;;  %s968_s1 = int_to_ptr.vmem [resolvable:$false] %s967_s1 }
  0x4f   : > { %725 = vmatpush3.msra.mxu0 %v308_v1  ;;  %757 = vmatprep.subr.mxu1 %v409_v6  ;;  %v304_v8 = vld [vmem:[#allocation5 + $0x50] sm:$0xff]  ;;  %v302_v12 = vld [vmem:[#allocation5 + $0x40] sm:$0xff]  ;;  %v405_v13 = vld [vmem:[#allocation7 + $0x58] sm:$0xff]  ;;  %vm415_vm0 = vcmp.lt.s32.totalorder %v414_v42, 8  ;;  %s969_s30 = scalar_lea.vmem %s968_s1, 512  ;;  %p970_p8 = scmp.lt.s32.totalorder %s1264_s10, %s968_s1 }
  0x50   : > { %726 = vmatprep.subr.mxu0 %v307_v2  ;;  %758 = vmatpush3.msra.mxu1 %v409_v6  ;;  %v301_v14 = vld [vmem:[#allocation5 + $0x38] sm:$0xff]  ;;  %v404_v15 = vld [vmem:[#allocation7 + $0x50] sm:$0xff]  ;;  %v403_v17 = vld [vmem:[#allocation7 + $0x48] sm:$0xff]  ;;  %v418_v44 = vsel %vm415_vm0, %v1235_v4, 0.0  ;;  %p965_p4 = pnand %p964_p1, %p1188_p3  ;;  %p971_p10 = scmp.lt.s32.totalorder %s969_s30, %s963_s28 }
  0x51   : > { %727 = vmatpush3.msra.mxu0 %v307_v2  ;;  %759 = vmatprep.subr.mxu1 %v408_v7  ;;  %v300_v16 = vld [vmem:[#allocation5 + $0x30] sm:$0xff]  ;;  %v299_v18 = vld [vmem:[#allocation5 + $0x28] sm:$0xff]  ;;  %v402_v19 = vld [vmem:[#allocation7 + $0x40] sm:$0xff] }
  0x52   : > { %728 = vmatprep.subr.mxu0 %v306_v3  ;;  %760 = vmatpush3.msra.mxu1 %v408_v7  ;;  %v298_v20 = vld [vmem:[#allocation5 + $0x20] sm:$0xff]  ;;  %v401_v21 = vld [vmem:[#allocation7 + $0x38] sm:$0xff]  ;;  %v400_v23 = vld [vmem:[#allocation7 + $0x30] sm:$0xff]  ;;  %p966_p6 = pneg %p965_p4  ;;  %p972_p11 = por %p971_p10, %p970_p8 }
  0x53   : > { %729 = vmatpush3.msra.mxu0 %v306_v3  ;;  %761 = vmatprep.subr.mxu1 %v407_v9  ;;  %v297_v22 = vld [vmem:[#allocation5 + $0x18] sm:$0xff]  ;;  %v296_v24 = vld [vmem:[#allocation5 + $0x10] sm:$0xff]  ;;  %v399_v25 = vld [vmem:[#allocation7 + $0x28] sm:$0xff] }
  0x54   : > { %730 = vmatprep.subr.mxu0 %v305_v5  ;;  %762 = vmatpush3.msra.mxu1 %v407_v9  ;;  %v295_v26 = vld [vmem:[#allocation5 + $0x8] sm:$0xff]  ;;  %v398_v27 = vld [vmem:[#allocation7 + $0x20] sm:$0xff]  ;;  %v397_v30 = vld [vmem:[#allocation7 + $0x18] sm:$0xff]  ;;  %p973_p2 = pnand %p972_p11, %p966_p6 }
  0x55   : > { %731 = vmatpush3.msra.mxu0 %v305_v5  ;;  %763 = vmatprep.subr.mxu1 %v406_v11  ;;  %v294_v28 = vld [vmem:[#allocation5] sm:$0xff]  ;;  %v293_v29 = vld [vmem:[%s1224_s24 + $0x8] sm:$0xff]  ;;  %v396_v31 = vld [vmem:[#allocation7 + $0x10] sm:$0xff]  ;;  %s1262_s24 = scalar_lea.hbm %s1317_s5, %s685_s6 }
  0x56   : > { %732 = vmatprep.subr.mxu0 %v304_v8  ;;  %764 = vmatpush3.msra.mxu1 %v406_v11  ;;  %v395_v32 = vld [vmem:[#allocation7 + $0x8] sm:$0xff]  ;;  %v394_v33 = vld [vmem:[#allocation7] sm:$0xff]  ;;  %v419_v50 = vsel %vm415_vm0, %v293_v29, 0.0 }
  0x57   : > { %733 = vmatpush3.msra.mxu0 %v304_v8  ;;  %765 = vmatprep.subr.mxu1 %v405_v13  ;;  %v675_v34 = vld [vmem:[%s1314_s2] ss:$0 sm:$0xff]  ;;  %v677_v5 = vld [vmem:[%s1316_s4 + $0x1] ss:$0 sm:$0xff]  ;;  %v678_v7 = vld [vmem:[%s1316_s4 + $0x2] ss:$0 sm:$0xff] }
  0x58   : > { %734 = vmatprep.subr.mxu0 %v303_v10  ;;  %766 = vmatpush3.msra.mxu1 %v405_v13  ;;  %v676_v45 = vld [vmem:[%s1316_s4] ss:$0 sm:$0xff] }
  0x59   : > { %735 = vmatpush3.msra.mxu0 %v303_v10  ;;  %767 = vmatprep.subr.mxu1 %v404_v15 }
  0x5a   : > { %736 = vmatprep.subr.mxu0 %v302_v12  ;;  %768 = vmatpush3.msra.mxu1 %v404_v15 }
  0x5b   : > { %737 = vmatpush3.msra.mxu0 %v302_v12  ;;  %769 = vmatprep.subr.mxu1 %v403_v17 }
  0x5c   : > { %738 = vmatprep.subr.mxu0 %v301_v14  ;;  %770 = vmatpush3.msra.mxu1 %v403_v17 }
  0x5d   : > { %739 = vmatpush3.msra.mxu0 %v301_v14  ;;  %771 = vmatprep.subr.mxu1 %v402_v19 }
  0x5e   : > { %740 = vmatprep.subr.mxu0 %v300_v16  ;;  %772 = vmatpush3.msra.mxu1 %v402_v19 }
  0x5f   : > { %741 = vmatpush3.msra.mxu0 %v300_v16  ;;  %773 = vmatprep.subr.mxu1 %v401_v21 }
  0x60   : > { %742 = vmatprep.subr.mxu0 %v299_v18  ;;  %774 = vmatpush3.msra.mxu1 %v401_v21 }
  0x61   : > { %743 = vmatpush3.msra.mxu0 %v299_v18  ;;  %775 = vmatprep.subr.mxu1 %v400_v23 }
  0x62   : > { %744 = vmatprep.subr.mxu0 %v298_v20  ;;  %776 = vmatpush3.msra.mxu1 %v400_v23 }
  0x63   : > { %745 = vmatpush3.msra.mxu0 %v298_v20  ;;  %777 = vmatprep.subr.mxu1 %v399_v25 }
  0x64   : > { %746 = vmatprep.subr.mxu0 %v297_v22  ;;  %778 = vmatpush3.msra.mxu1 %v399_v25 }
  0x65   : > { %747 = vmatpush3.msra.mxu0 %v297_v22  ;;  %779 = vmatprep.subr.mxu1 %v398_v27 }
  0x66   : > { %748 = vmatprep.subr.mxu0 %v296_v24  ;;  %780 = vmatpush3.msra.mxu1 %v398_v27 }
  0x67   : > { %749 = vmatpush3.msra.mxu0 %v296_v24  ;;  %781 = vmatprep.subr.mxu1 %v397_v30 }
  0x68   : > { %750 = vmatprep.subr.mxu0 %v295_v26  ;;  %782 = vmatpush3.msra.mxu1 %v397_v30 }
  0x69   : > { %751 = vmatpush3.msra.mxu0 %v295_v26  ;;  %783 = vmatprep.subr.mxu1 %v396_v31 }
  0x6a   : > { %752 = vmatprep.subr.mxu0 %v294_v28  ;;  %784 = vmatpush3.msra.mxu1 %v396_v31 }
  0x6b   : > { %753 = vmatpush3.msra.mxu0 %v294_v28  ;;  %785 = vmatprep.subr.mxu1 %v395_v32 }
  0x6c   : > { %755 = vmatmul.mubr.f32.vlgmr.msra.gmra.mxu0 %v293_v29  ;;  %786 = vmatpush3.msra.mxu1 %v395_v32 }
  0x6d   : > { %787 = vmatprep.subr.mxu1 %v394_v33 }
  0x6e   : > { %788 = vmatpush3.msra.mxu1 %v394_v33 }
 0x12c   : > { %v756_v35 = vpop.f32.mrf.mxu0 }
 0x12d   : > { %v389_v36 = vadd.f32 %v756_v35, %v675_v34 }
 0x12e   : > { %v383_v37 = vpop.f32.mrf.mxu0 }
 0x12f   : > { %v384_v38 = vadd.f32 %v675_v34, %v383_v37  ;;  %v393_v40 = vmax.f32 %v389_v36, 0.0 }
 0x131   : > { %v392_v39 = vmax.f32 %v384_v38, 0.0 }
 0x133   : > { %789 = vmatprep.mubr.f32.mxu1 %v392_v39 }
 0x134   : > { %790 = vmatmul.mubr.f32.vlgmr.msra.gmra.mxu1 %v393_v40 }
 0x1f4   : > { %v791_v43 = vpop.f32.mrf.mxu1 }
 0x1f5   : > { %v496_v48 = vadd.f32 %v791_v43, %v676_v45 }
 0x1f6   : > { %v490_v46 = vpop.f32.mrf.mxu1 }
 0x1f7   : > { %v491_v47 = vadd.f32 %v676_v45, %v490_v46  ;;  %v500_v51 = vadd.f32 %v496_v48, %v419_v50 }
 0x1f9   : > { %v499_v49 = vadd.f32 %v491_v47, %v418_v44 }
 0x1fb   : > { %501 = vadd.xlane.f32.xlu0 %v499_v49 }
 0x1ff   : > { %503 = vadd.xlane.f32.xlu0 %v500_v51 }
 0x284   : > { %v502_v52 = vpop.xlane.xlu0 %501 }
 0x285   : > { %v505_v53 = vmul.f32 0.125, %v502_v52 }
 0x287   : > { %v507_v54 = vsub.f32 %v499_v49, %v505_v53 }
 0x288   : > { %v504_v55 = vpop.xlane.xlu0 %503 }
 0x289   : > { %v506_v56 = vmul.f32 0.125, %v504_v55  ;;  %v509_v57 = vsel %vm415_vm0, %v507_v54, 0.0 }
 0x28a   : > { %v511_v58 = vmul.f32 %v509_v57, %v509_v57 }
 0x28b   : > { %v508_v59 = vsub.f32 %v500_v51, %v506_v56 }
 0x28c   : > { %513 = vadd.xlane.f32.xlu1 %v511_v58 }
 0x28d   : > { %v510_v60 = vsel %vm415_vm0, %v508_v59, 0.0 }
 0x28e   : > { %v512_v61 = vmul.f32 %v510_v60, %v510_v60 }
 0x290   : > { %515 = vadd.xlane.f32.xlu1 %v512_v61 }
 0x315   : > { %v514_v62 = vpop.xlane.xlu1 %513 }
 0x316   : > { %v517_v63 = vmul.f32 0.125, %v514_v62 }
 0x318   : > { %v519_v0 = vadd.f32 1e-05, %v517_v63 }
 0x319   : > { %v516_v1 = vpop.xlane.xlu1 %515 }
 0x31a   : > { %879 = vrsqrt.f32 %v519_v0  ;;  %v518_v2 = vmul.f32 0.125, %v516_v1 }
 0x31c   : > { %v520_v3 = vadd.f32 1e-05, %v518_v2 }
 0x31e   : > { %881 = vrsqrt.f32 %v520_v3 }
 0x327   : > { %v880_v4 = vpop.eup %879 }
 0x328   : > { %v523_v6 = vmul.f32 %v880_v4, %v507_v54 }
 0x32a   : > { %v529_v8 = vmul.f32 %v677_v5, %v523_v6 }
 0x32b   : > { %v882_v9 = vpop.eup %881 }
 0x32c   : > { %v535_v10 = vadd.f32 %v678_v7, %v529_v8  ;;  %v524_v11 = vmul.f32 %v882_v9, %v508_v59 }
 0x32e   : > { %v530_v12 = vmul.f32 %v677_v5, %v524_v11  ;;  %537 = vst [vmem:[%s289_s11] sm:$0xff] %v535_v10 }
 0x330   : > { %v536_v13 = vadd.f32 %v678_v7, %v530_v12 }
 0x332   : > { %538 = vst [vmem:[%s289_s11 + $0x8] sm:$0xff] %v536_v13 }
 0x333   : > { %976 = shalt.err (!%p973_p2)
}
 0x334   : > { %s977_s12 = scalar_lea.hbm %s1262_s24, 256  ;;  %s981_s27 = scalar_lea.hbm %s1317_s5, 512 }
 0x335   : > { %p978_p9 = scmp.ne.s32.totalorder %s1262_s24, %s977_s12  ;;  %p982_p0 = scmp.lt.s32.totalorder %s1262_s24, %s1317_s5 }
 0x336   : > { %p983_p7 = scmp.lt.s32.totalorder %s981_s27, %s977_s12 }
 0x337   : > { %p979_p12 = pnand %p978_p9, %p1188_p3 }
 0x338   : > { %p984_p5 = por %p983_p7, %p982_p0 }
 0x339   : > { %p980_p13 = pneg %p979_p12 }
 0x33b   : > { %p985_p1 = pnand %p984_p5, %p980_p13 }
 0x33d   : > { %988 = shalt.err (!%p985_p1)
}
 0x33e   : > { %s1055_s11 = smov 128   ;;  %s1056_s15 = smov 8  }
 0x33f   : > { %802 = dma.vmem_to_hbm [thread:$0]  (%p1188_p3), %s1264_s10, 256, %s1262_s24, %s540_s26, %s1055_s11, %s1055_s11, %s1056_s15  }
 0x340 PF: > { %s570_s16 = sand.u32 1, %s1027_s18   ;;  %p1332_p4 = scmp.ne.s32.totalorder %s1324_s29, 0 }
 0x341   : > { %p1333_p6 = scmp.ge.s32.totalorder %s1047_s23, 2  ;;  %s571_s28 = scalar_lea.sflag [#allocation4], %s570_s16 }
 0x343   : > { %p816_p8 = pnand %p1333_p6, %p1332_p4 }
 0x345   : > { %p817_p10 = pneg %p816_p8 }
 0x347   : > { %1022 = dma.done.wait (%p817_p10), %s571_s28, 256  }
 0x348   : > { %1024 = vsyncadd (%p817_p10), %s571_s28, 4294967040  ;;  %s22_s23 = sadd.s32 1, %s1047_s23   ;;  %s1334_s18 = smov %s1031_s19 }
 0x349   : > { %p19_p11 = scmp.ge.s32.totalorder %s22_s23, 4   ;;  %s1335_s19 = smov %s1035_s20 }
 0x34a   : > { %s1336_s20 = smov %s1197_s14  ;;  %s1337_s21 = smov %s1043_s22 }
 0x34b   : > { %s1338_s22 = smov %s1340_s25  ;;  %21 = sbr.rel (!%p19_p11) target bundleno = 9 (0x9), region = 93 }
 0x350   :  { %576 = vsyncpa [#allocation3], 1 }
 0x351   :  { %578 = vsyncpa [#allocation3 + $0x1], 1 }
 0x352   :  { %579 = vsyncpa [#allocation6], 1 }
 0x353   :  { %580 = vsyncpa [#allocation4], 1 }
 0x354   :  { %582 = vsyncpa [#allocation4 + $0x1], 1 }

</bundles_post_ra>
